<compile_context>
chip_gen: v5e
topology: v5e:2x2
jax: 0.10.0
libtpu: 0.0.40
codegen_flags: <defaults>
</compile_context>

<pallas_src>
import functools

import jax
import jax.numpy as jnp
from jax.experimental import pallas as pl
from jax.experimental.pallas import tpu as pltpu

BN_EPS = 1e-5
_LANE = 128
_SUBLANE = 8


def _round_up(x, m):
    return (x + m - 1) // m * m


def _cdiv(a, b):
    return (a + b - 1) // b


def _vmem_budget_bytes():
    """Generation-aware VMEM budget: ~75% of physical (48 MiB v7x, 96 MiB v5e/v6e)."""
    cap = 64 * 1024 * 1024  # conservative fallback: v7x physical VMEM per TensorCore
    try:
        info_cap = int(pltpu.get_tpu_info().vmem_capacity_bytes)
        if info_cap > 0:
            cap = info_cap
    except Exception:
        pass
    return int(0.75 * cap)


# --------------------------------------------------------------------------------------
# Kernels
# --------------------------------------------------------------------------------------
def _fused_kernel(x_ref, wp_ref, gamma_ref, wc_ref, y_ref, acc_ref,
                  *, d_total, tk, compute_dtype):
    """Projector Linear -> BatchNorm1dNoBias (batch stats) -> classifier Linear, fused.

    Grid axis 0 tiles the flatten dim D (reduction / "arbitrary" axis).
      x_ref:     (B, tk)       input dtype (f32 or bf16), cast in-kernel
      wp_ref:    (H, tk)       projector weight, PyTorch (out, in) layout, tiled on in-dim
      gamma_ref: (1, H)        f32 BN weight
      wc_ref:    (Cpad, H)     f32 classifier weight, class rows zero-padded to a lane
      y_ref:     (B, Cpad)     f32 output (lane-dense)
      acc_ref:   (B, H)        f32 accumulator scratch, resident across the grid
    """
    k = pl.program_id(0)

    @pl.when(k == 0)
    def _init():
        acc_ref[...] = jnp.zeros_like(acc_ref)

    x = x_ref[...]
    w = wp_ref[...]
    if d_total % tk != 0:
        # Boundary block of the last grid step reads unspecified lanes past D: mask both
        # operands (garbage could be NaN/Inf, so zeroing only one side is not enough).
        valid = d_total - k * tk                      # >= tk for every non-final step
        col = jax.lax.broadcasted_iota(jnp.int32, (1, tk), 1)
        keep = col < valid
        x = jnp.where(keep, x, 0.0)
        w = jnp.where(keep, w, 0.0)

    # Cast HBM-resident operands to the MXU dtype right before the dot (f32 accumulate).
    acc_ref[...] += jax.lax.dot_general(
        x.astype(compute_dtype), w.astype(compute_dtype),
        dimension_numbers=(((1,), (1,)), ((), ())),
        preferred_element_type=jnp.float32,
    )

    @pl.when(k == pl.num_programs(0) - 1)
    def _epilogue():
        h_lin = acc_ref[...]                                         # (B, H) f32
        mean = jnp.mean(h_lin, axis=0, keepdims=True)                # (1, H)
        centered = h_lin - mean
        var = jnp.mean(centered * centered, axis=0, keepdims=True)   # biased batch variance
        scale = gamma_ref[...] * jax.lax.rsqrt(var + BN_EPS)         # (1, H)
        wc_scaled = wc_ref[...] * scale                              # (Cpad, H)
        # BN(h_lin) @ wc^T == (h_lin - mean) @ (wc * scale)^T   (beta frozen at 0)
        y_ref[...] = jax.lax.dot_general(
            centered, wc_scaled,
            dimension_numbers=(((1,), (1,)), ((), ())),
            preferred_element_type=jnp.float32)


def _proj_kernel(x_ref, wp_ref, h_ref, acc_ref, *, d_total, tk, compute_dtype):
    """Batch-parallel projector: h_lin = x @ w_proj^T for one B-tile.

    Grid = (n_b ["parallel"], n_k ["arbitrary"]).  BN statistics couple the whole batch,
    so the (tiny) BN + classifier epilogue runs outside this kernel.
    """
    k = pl.program_id(1)

    @pl.when(k == 0)
    def _init():
        acc_ref[...] = jnp.zeros_like(acc_ref)

    x = x_ref[...]
    w = wp_ref[...]
    if d_total % tk != 0:
        valid = d_total - k * tk
        col = jax.lax.broadcasted_iota(jnp.int32, (1, tk), 1)
        keep = col < valid
        x = jnp.where(keep, x, 0.0)
        w = jnp.where(keep, w, 0.0)

    acc_ref[...] += jax.lax.dot_general(
        x.astype(compute_dtype), w.astype(compute_dtype),
        dimension_numbers=(((1,), (1,)), ((), ())),
        preferred_element_type=jnp.float32,
    )

    @pl.when(k == pl.num_programs(1) - 1)
    def _done():
        h_ref[...] = acc_ref[...]


# --------------------------------------------------------------------------------------
# Wrapper
# --------------------------------------------------------------------------------------
def task_discovery_encoder_forward(x_nchw, w_proj, gamma, beta, w_cls, *,
                                   tk=None, batch_tile=None,
                                   compute_dtype=jnp.bfloat16,
                                   force_batch_parallel=None):
    """JAX wrapper mirroring TaskDiscoveryEncoder.forward(x, out='y', get_loss=True).

    Args:
      x_nchw: (B, C, H, W) input.
      w_proj: (h_dim, backbone_dim) projector Linear weight (PyTorch layout).
      gamma:  (h_dim,) BatchNorm1dNoBias weight.
      beta:   (h_dim,) BatchNorm1dNoBias bias — frozen at zero by the module; unused.
      w_cls:  (n_classes, h_dim) classifier Linear weight (PyTorch layout).
      tk:     optional tile-width target along D (rounded to 128, clamped to VMEM budget).
      batch_tile: optional B-tile for the batch-parallel path.
      compute_dtype: MXU operand dtype (accumulation is always f32).
      force_batch_parallel: True/False to force the large-B (split) / fused path.
    Returns:
      (y, loss): y (B, n_classes) f32, loss (1,) f32 zeros (h_loss is None).
    """
    del beta  # BatchNorm1dNoBias: bias zeroed and frozen -> identically zero.

    B = x_nchw.shape[0]
    h_dim, D = w_proj.shape
    n_classes = w_cls.shape[0]

    # flatten(start_dim=1): free reshape of contiguous NCHW — no copy, no cast.
    x_flat = x_nchw.reshape(B, -1)
    assert x_flat.shape[1] == D, "flatten dim must match projector in_features"

    x_bytes = jnp.dtype(x_flat.dtype).itemsize
    w_bytes = jnp.dtype(w_proj.dtype).itemsize
    budget = _vmem_budget_bytes()

    gamma2 = gamma.reshape(1, h_dim).astype(jnp.float32)                      # (1, H)
    c_pad = max(_round_up(n_classes, _LANE), _LANE)                            # lane-dense out
    wc_pad = jnp.pad(w_cls.astype(jnp.float32), ((0, c_pad - n_classes), (0, 0)))

    # Batch-resident (fused) path footprint at the smallest streaming tile.
    fused_resident = (B * h_dim * 4                       # f32 accumulator
                      + 2 * B * c_pad * 4                 # output block (double-buffered)
                      + 2 * (h_dim + c_pad * h_dim) * 4)  # gamma + classifier weight
    fused_min_stream = 2 * (B * x_bytes + h_dim * w_bytes) * _LANE
    use_fused = (fused_resident + fused_min_stream) <= budget
    if force_batch_parallel is not None:
        use_fused = not force_batch_parallel

    if use_fused:
        # ---- tile width from the VMEM budget (double-buffered x and w_proj tiles) ----
        tk_cap = (budget - fused_resident) // (2 * (B * x_bytes + h_dim * w_bytes))
        tk_cap = max(_LANE, (tk_cap // _LANE) * _LANE)
        tk_target = tk if tk is not None else 8192        # small-B default: big tiles
        tk_target = max(_LANE, min(tk_target, tk_cap, _round_up(D, _LANE)))
        n_k = _cdiv(D, tk_target)
        tk_sel = min(_round_up(_cdiv(D, n_k), _LANE), tk_cap)   # padding <= 127 lanes
        n_k = _cdiv(D, tk_sel)

        vmem_need = fused_resident + 2 * (B * x_bytes + h_dim * w_bytes) * tk_sel
        vmem_limit = int(min(max(2 * vmem_need, 32 * 1024 * 1024), budget))

        cost = pl.CostEstimate(
            flops=2 * B * D * h_dim + 2 * B * h_dim * c_pad,
            transcendentals=h_dim,
            bytes_accessed=(x_flat.size * x_bytes + w_proj.size * w_bytes
                            + (gamma2.size + wc_pad.size + B * c_pad) * 4),
        )

        y_pad = pl.pallas_call(
            functools.partial(_fused_kernel, d_total=D, tk=tk_sel,
                              compute_dtype=compute_dtype),
            out_shape=jax.ShapeDtypeStruct((B, c_pad), jnp.float32),
            grid_spec=pltpu.PrefetchScalarGridSpec(
                num_scalar_prefetch=0,
                grid=(n_k,),
                in_specs=[
                    pl.BlockSpec((B, tk_sel), lambda k: (0, k)),         # x tile
                    pl.BlockSpec((h_dim, tk_sel), lambda k: (0, k)),     # w_proj tile
                    pl.BlockSpec((1, h_dim), lambda k: (0, 0)),          # gamma (resident)
                    pl.BlockSpec((c_pad, h_dim), lambda k: (0, 0)),      # w_cls (resident)
                ],
                out_specs=pl.BlockSpec((B, c_pad), lambda k: (0, 0)),
                scratch_shapes=[pltpu.VMEM((B, h_dim), jnp.float32)],
            ),
            compiler_params=pltpu.CompilerParams(
                dimension_semantics=("arbitrary",),
                vmem_limit_bytes=vmem_limit,
            ),
            cost_estimate=cost,
        )(x_flat, w_proj, gamma2, wc_pad)
        y = y_pad[:, :n_classes]
    else:
        # ---- batch-parallel projector (v7x dual-TC / very large B) ----
        tb = batch_tile if batch_tile is not None else 256
        tb = max(_SUBLANE, min(_round_up(tb, _SUBLANE), _round_up(B, _SUBLANE)))
        split_resident = tb * h_dim * 4 + 2 * tb * h_dim * 4        # acc + h_lin block
        tk_cap = (budget - split_resident) // (2 * (tb * x_bytes + h_dim * w_bytes))
        tk_cap = max(_LANE, (tk_cap // _LANE) * _LANE)
        tk_target = tk if tk is not None else 4096
        tk_target = max(_LANE, min(tk_target, tk_cap, _round_up(D, _LANE)))
        n_k = _cdiv(D, tk_target)
        tk_sel = min(_round_up(_cdiv(D, n_k), _LANE), tk_cap)
        n_k = _cdiv(D, tk_sel)
        n_b = _cdiv(B, tb)

        vmem_need = split_resident + 2 * (tb * x_bytes + h_dim * w_bytes) * tk_sel
        vmem_limit = int(min(max(2 * vmem_need, 32 * 1024 * 1024), budget))

        h_lin = pl.pallas_call(
            functools.partial(_proj_kernel, d_total=D, tk=tk_sel,
                              compute_dtype=compute_dtype),
            out_shape=jax.ShapeDtypeStruct((B, h_dim), jnp.float32),
            grid_spec=pltpu.PrefetchScalarGridSpec(
                num_scalar_prefetch=0,
                grid=(n_b, n_k),
                in_specs=[
                    pl.BlockSpec((tb, tk_sel), lambda b, k: (b, k)),
                    pl.BlockSpec((h_dim, tk_sel), lambda b, k: (0, k)),
                ],
                out_specs=pl.BlockSpec((tb, h_dim), lambda b, k: (b, 0)),
                scratch_shapes=[pltpu.VMEM((tb, h_dim), jnp.float32)],
            ),
            compiler_params=pltpu.CompilerParams(
                dimension_semantics=("parallel", "arbitrary"),
                vmem_limit_bytes=vmem_limit,
            ),
        )(x_flat, w_proj)

        # Full-batch BN stats + tiny classifier (O(B*h_dim)): plain fused XLA op, since the
        # statistics couple every B-tile and the cost is negligible vs. the projector.
        mean = jnp.mean(h_lin, axis=0, keepdims=True)
        centered = h_lin - mean
        var = jnp.mean(centered * centered, axis=0, keepdims=True)
        scale = gamma2 * jax.lax.rsqrt(var + BN_EPS)
        y = jnp.dot(centered * scale, w_cls.astype(jnp.float32).T,
                    preferred_element_type=jnp.float32)

    # TODO(synk): BatchNorm running_mean/running_var updates (training-mode side effects)
    # are not modeled; forward uses batch statistics exactly like the PyTorch module.
    loss = jnp.zeros((1,), dtype=jnp.float32)  # h_loss is None -> torch.zeros(1)
    return y, loss


def _reference_forward(x_nchw, w_proj, gamma, beta, w_cls, compute_dtype=jnp.float32):
    """Pure-JAX reference of the same forward (matmul operands cast to compute_dtype,
    f32 accumulation) — used for the correctness check against the kernel."""
    B = x_nchw.shape[0]
    x_flat = x_nchw.reshape(B, -1)
    h_lin = jnp.dot(x_flat.astype(compute_dtype), w_proj.astype(compute_dtype).T,
                    preferred_element_type=jnp.float32)
    mean = jnp.mean(h_lin, axis=0, keepdims=True)
    var = jnp.mean((h_lin - mean) ** 2, axis=0, keepdims=True)
    h = (h_lin - mean) * jax.lax.rsqrt(var + BN_EPS) * gamma[None, :] + beta[None, :]
    return jnp.dot(h, w_cls.astype(jnp.float32).T)


if __name__ == "__main__":
    # arch='flatten' on a (B, C, H, W) = (2, 4, 16, 16) input -> backbone_dim = 1024.
    B, C, H, W = 2, 4, 16, 16
    backbone_dim = C * H * W
    h_dim = 128
    n_classes = 2

    key = jax.random.PRNGKey(0)
    k_x, k_wp, k_wc, k_x2 = jax.random.split(key, 4)

    x = jax.random.normal(k_x, (B, C, H, W), dtype=jnp.float32)

    # Deterministic synthetic parameters (shapes match nn.Linear / BatchNorm1d).
    bound_p = 1.0 / (backbone_dim ** 0.5)
    w_proj = jax.random.uniform(k_wp, (h_dim, backbone_dim), jnp.float32,
                                minval=-bound_p, maxval=bound_p)
    bound_c = 1.0 / (h_dim ** 0.5)
    w_cls = jax.random.uniform(k_wc, (n_classes, h_dim), jnp.float32,
                               minval=-bound_c, maxval=bound_c)
    gamma = jnp.ones((h_dim,), jnp.float32)   # BatchNorm1d weight
    beta = jnp.zeros((h_dim,), jnp.float32)   # BatchNorm1dNoBias: bias zeroed & frozen

    # Matched-precision reference (bf16 matmul operands, f32 accumulation) — the only
    # intentional deviation from pure-f32 PyTorch numerics is that bf16 operand cast.
    y_ref = _reference_forward(x, w_proj, gamma, beta, w_cls, compute_dtype=jnp.bfloat16)

    # 1) Default config: fused path collapses to a single grid step (tk = D).
    y, loss = task_discovery_encoder_forward(x, w_proj, gamma, beta, w_cls)
    y = jax.block_until_ready(y)
    loss = jax.block_until_ready(loss)
    assert y.shape == (B, n_classes) and loss.shape == (1,)
    assert jnp.allclose(y, y_ref, atol=5e-3, rtol=5e-3), "fused single-step mismatch"
    assert jnp.all(loss == 0.0)

    # 2) Multi-step reduction with a ragged last tile (tk=384 -> 3 steps, in-kernel mask).
    y2, _ = task_discovery_encoder_forward(x, w_proj, gamma, beta, w_cls, tk=384)
    y2 = jax.block_until_ready(y2)
    assert jnp.allclose(y2, y_ref, atol=5e-3, rtol=5e-3), "ragged multi-step mismatch"

    # 3) Batch-parallel (split) path, as used for very large B / v7x dual-TC.
    B2 = 16
    x2 = jax.random.normal(k_x2, (B2, C, H, W), dtype=jnp.float32)
    y3, _ = task_discovery_encoder_forward(x2, w_proj, gamma, beta, w_cls,
                                           force_batch_parallel=True, batch_tile=8)
    y3 = jax.block_until_ready(y3)
    y3_ref = _reference_forward(x2, w_proj, gamma, beta, w_cls, compute_dtype=jnp.bfloat16)
    assert jnp.allclose(y3, y3_ref, atol=5e-3, rtol=5e-3), "batch-parallel path mismatch"

    print("KERNEL_OK")
</pallas_src>

<mosaic_0001>
module attributes {stable_mosaic.version = 11 : i64} {
  func.func @_fused_kernel(%arg0: i32, %arg1: memref<2x1024xf32, #tpu.memory_space<vmem>>, %arg2: memref<128x1024xf32, #tpu.memory_space<vmem>>, %arg3: memref<1x128xf32, #tpu.memory_space<vmem>>, %arg4: memref<128x128xf32, #tpu.memory_space<vmem>>, %arg5: memref<2x128xf32, #tpu.memory_space<vmem>>, %arg6: memref<2x128xf32, #tpu.memory_space<vmem>>) attributes {dimension_semantics = [#tpu.dimension_semantics<arbitrary>], iteration_bounds = array<i64: 1>, scalar_prefetch = 0 : i64, scratch_operands = 1 : i64, tpu.core_type = #tpu.core_type<tc>, window_params = [{transform_indices = @transform_0, window_bounds = array<i64: 2, 1024>}, {transform_indices = @transform_1, window_bounds = array<i64: 128, 1024>}, {pipeline_mode = #tpu.pipeline_mode<synchronous>, transform_indices = @transform_2, window_bounds = array<i64: 1, 128>}, {pipeline_mode = #tpu.pipeline_mode<synchronous>, transform_indices = @transform_3, window_bounds = array<i64: 128, 128>}, {pipeline_mode = #tpu.pipeline_mode<synchronous>, transform_indices = @transform_4, window_bounds = array<i64: 2, 128>}]} {
    %c0_i32 = arith.constant 0 : i32
    %0 = arith.cmpi eq, %arg0, %c0_i32 : i32
    %1 = arith.extui %0 : i1 to i32
    %c0_i32_0 = arith.constant 0 : i32
    %2 = arith.cmpi ne, %1, %c0_i32_0 : i32
    scf.if %2 {
      %cst_10 = arith.constant 0.000000e+00 : f32
      %14 = vector.broadcast %cst_10 : f32 to vector<2x128xf32>
      %c0_11 = arith.constant 0 : index
      %c0_12 = arith.constant 0 : index
      %15 = vector.load %arg6[%c0_11, %c0_12] : memref<2x128xf32, #tpu.memory_space<vmem>>, vector<2x128xf32>
      tpu.vector_store %arg6[%c0_11, %c0_12], %14 {strides = array<i32>} : memref<2x128xf32, #tpu.memory_space<vmem>>, vector<2x128xf32>,
    } else {
    }
    %c0 = arith.constant 0 : index
    %c0_1 = arith.constant 0 : index
    %3 = vector.load %arg1[%c0, %c0_1] : memref<2x1024xf32, #tpu.memory_space<vmem>>, vector<2x1024xf32>
    %c0_2 = arith.constant 0 : index
    %c0_3 = arith.constant 0 : index
    %4 = vector.load %arg2[%c0_2, %c0_3] : memref<128x1024xf32, #tpu.memory_space<vmem>>, vector<128x1024xf32>
    %c0_4 = arith.constant 0 : index
    %c0_5 = arith.constant 0 : index
    %5 = vector.load %arg6[%c0_4, %c0_5] : memref<2x128xf32, #tpu.memory_space<vmem>>, vector<2x128xf32>
    %6 = arith.truncf %3 : vector<2x1024xf32> to vector<2x1024xbf16>
    %7 = arith.truncf %4 : vector<128x1024xf32> to vector<128x1024xbf16>
    %cst = arith.constant dense<0.000000e+00> : vector<2x128xf32>
    %8 = tpu.matmul %6, %7, %cst {dimension_numbers = #tpu.dot_dimension_numbers<[1], [1], [0], [0], [0, 0, 1, 0], [], []>} : vector<2x1024xbf16>, vector<128x1024xbf16>, vector<2x128xf32> -> vector<2x128xf32>
    %9 = arith.addf %5, %8 : vector<2x128xf32>
    %c0_6 = arith.constant 0 : index
    %c0_7 = arith.constant 0 : index
    %10 = vector.load %arg6[%c0_6, %c0_7] : memref<2x128xf32, #tpu.memory_space<vmem>>, vector<2x128xf32>
    tpu.vector_store %arg6[%c0_6, %c0_7], %9 {strides = array<i32>} : memref<2x128xf32, #tpu.memory_space<vmem>>, vector<2x128xf32>,
    %c0_i32_8 = arith.constant 0 : i32
    %11 = arith.cmpi eq, %arg0, %c0_i32_8 : i32
    %12 = arith.extui %11 : i1 to i32
    %c0_i32_9 = arith.constant 0 : i32
    %13 = arith.cmpi ne, %12, %c0_i32_9 : i32
    scf.if %13 {
      %c0_10 = arith.constant 0 : index
      %c0_11 = arith.constant 0 : index
      %14 = vector.load %arg6[%c0_10, %c0_11] : memref<2x128xf32, #tpu.memory_space<vmem>>, vector<2x128xf32>
      %cst_12 = arith.constant dense<0.000000e+00> : vector<128xf32>
      %15 = vector.multi_reduction <add>, %14, %cst_12 [0] : vector<2x128xf32> to vector<128xf32>
      %16 = vector.shape_cast %15 : vector<128xf32> to vector<1x128xf32>
      %cst_13 = arith.constant 2.000000e+00 : f32
      %17 = vector.broadcast %cst_13 : f32 to vector<1x128xf32>
      %18 = arith.divf %16, %17 : vector<1x128xf32>
      %19 = vector.broadcast %18 : vector<1x128xf32> to vector<2x128xf32>
      %20 = arith.subf %14, %19 : vector<2x128xf32>
      %21 = arith.mulf %20, %20 : vector<2x128xf32>
      %cst_14 = arith.constant dense<0.000000e+00> : vector<128xf32>
      %22 = vector.multi_reduction <add>, %21, %cst_14 [0] : vector<2x128xf32> to vector<128xf32>
      %23 = vector.shape_cast %22 : vector<128xf32> to vector<1x128xf32>
      %cst_15 = arith.constant 2.000000e+00 : f32
      %24 = vector.broadcast %cst_15 : f32 to vector<1x128xf32>
      %25 = arith.divf %23, %24 : vector<1x128xf32>
      %c0_16 = arith.constant 0 : index
      %c0_17 = arith.constant 0 : index
      %26 = vector.load %arg3[%c0_16, %c0_17] : memref<1x128xf32, #tpu.memory_space<vmem>>, vector<1x128xf32>
      %cst_18 = arith.constant 9.99999974E-6 : f32
      %27 = vector.broadcast %cst_18 : f32 to vector<1x128xf32>
      %28 = arith.addf %25, %27 : vector<1x128xf32>
      %29 = math.rsqrt %28 : vector<1x128xf32>
      %30 = arith.mulf %26, %29 : vector<1x128xf32>
      %c0_19 = arith.constant 0 : index
      %c0_20 = arith.constant 0 : index
      %31 = vector.load %arg4[%c0_19, %c0_20] : memref<128x128xf32, #tpu.memory_space<vmem>>, vector<128x128xf32>
      %32 = vector.broadcast %30 : vector<1x128xf32> to vector<128x128xf32>
      %33 = arith.mulf %31, %32 : vector<128x128xf32>
      %cst_21 = arith.constant dense<0.000000e+00> : vector<2x128xf32>
      %34 = tpu.matmul %20, %33, %cst_21 {dimension_numbers = #tpu.dot_dimension_numbers<[1], [1], [0], [0], [0, 0, 1, 0], [], []>} : vector<2x128xf32>, vector<128x128xf32>, vector<2x128xf32> -> vector<2x128xf32>
      %c0_22 = arith.constant 0 : index
      %c0_23 = arith.constant 0 : index
      %35 = vector.load %arg5[%c0_22, %c0_23] : memref<2x128xf32, #tpu.memory_space<vmem>>, vector<2x128xf32>
      tpu.vector_store %arg5[%c0_22, %c0_23], %34 {strides = array<i32>} : memref<2x128xf32, #tpu.memory_space<vmem>>, vector<2x128xf32>,
    } else {
    }
    return
  }
  func.func @transform_0(%arg0: i32) -> (i32, i32) {
    %c0_i32 = arith.constant 0 : i32
    %c0_i32_0 = arith.constant 0 : i32
    return %c0_i32, %arg0 : i32, i32
  }
  func.func @transform_1(%arg0: i32) -> (i32, i32) {
    %c0_i32 = arith.constant 0 : i32
    %c0_i32_0 = arith.constant 0 : i32
    return %c0_i32, %arg0 : i32, i32
  }
  func.func @transform_2(%arg0: i32) -> (i32, i32) {
    %c0_i32 = arith.constant 0 : i32
    %c0_i32_0 = arith.constant 0 : i32
    %c0_i32_1 = arith.constant 0 : i32
    return %c0_i32, %c0_i32_0 : i32, i32
  }
  func.func @transform_3(%arg0: i32) -> (i32, i32) {
    %c0_i32 = arith.constant 0 : i32
    %c0_i32_0 = arith.constant 0 : i32
    %c0_i32_1 = arith.constant 0 : i32
    return %c0_i32, %c0_i32_0 : i32, i32
  }
  func.func @transform_4(%arg0: i32) -> (i32, i32) {
    %c0_i32 = arith.constant 0 : i32
    %c0_i32_0 = arith.constant 0 : i32
    %c0_i32_1 = arith.constant 0 : i32
    return %c0_i32, %c0_i32_0 : i32, i32
  }
}

</mosaic_0001>

<bundles_post_ra>
// kernel: tpu_custom_call.1
= control target key start
LH: loop header
LB: loop body
LE: loop exit
PB: predicated region body
PF: predicated region fallthrough
CT: control target
= control target key end

     0   :  { %9 = vsyncpa [#allocation4], 0  ;;  %s688_s0 = inlined_call_operand.hbm [shape: f32[2,1024], index: 0, kind: input, shape index: {}]   ;;  %s689_s1 = inlined_call_operand.hbm [shape: f32[128,1024], index: 1, kind: input, shape index: {}]   ;;  %s690_s2 = inlined_call_operand.vmem [shape: f32[1,128], index: 2, kind: input, shape index: {}]   ;;  %s691_s3 = inlined_call_operand.hbm [shape: f32[128,128], index: 3, kind: input, shape index: {}]   ;;  %s692_s4 = inlined_call_operand.hbm [shape: f32[2,128], index: 4, kind: output, shape index: {}]  }
   0x1   :  { %10 = vsyncpa [#allocation7], 0  ;;  %s27_s17 = sshll.u32 %s689_s1, 4  ;;  %s28_s17 = int_to_ptr.hbm [resolvable:$true] %s27_s17 }
   0x2   :  { %11 = vsyncpa [#allocation5], 0  ;;  %s631_s18 = smov [#allocation6]   ;;  %s17_s22 = sshll.u32 %s688_s0, 4  ;;  %s18_s22 = int_to_ptr.hbm [resolvable:$true] %s17_s22 }
   0x3   :  { %s29_s19 = sshll.u32 %s631_s18, 4  ;;  %s632_s23 = smov 1024   ;;  %s30_s19 = int_to_ptr.vmem [resolvable:$true] %s29_s19 }
   0x4   :  { %s633_s24 = smov 64   ;;  %s634_s25 = smov [#allocation3]  }
   0x5   :  { %35 = dma.hbm_to_vmem [thread:$0]  %s28_s17, 16384, %s30_s19, [#allocation7], %s632_s23, %s632_s23, %s633_s24  }
   0x6   :  { %s19_s26 = sshll.u32 %s634_s25, 4  ;;  %s42_s29 = sshll.u32 %s691_s3, 4  ;;  %s20_s26 = int_to_ptr.vmem [resolvable:$true] %s19_s26  ;;  %s43_s29 = int_to_ptr.hbm [resolvable:$true] %s42_s29 }
   0x7   :  { %22 = dma.hbm_to_vmem [thread:$0]  %s18_s22, 256, %s20_s26, [#allocation4]  }
   0x8   :  { %s635_s1 = smov [#allocation8]   ;;  %s636_s5 = smov 128  }
   0x9   :  { %s44_s30 = sshll.u32 %s635_s1, 4  ;;  %s637_s6 = smov 8   ;;  %s45_s30 = int_to_ptr.vmem [resolvable:$true] %s44_s30 }
   0xa   :  { %50 = dma.hbm_to_vmem [thread:$0]  %s43_s29, 2048, %s45_s30, [#allocation7], %s636_s5, %s636_s5, %s637_s6  }
   0xb   :  { %625 = dma.done.wait [#allocation4], 256  }
   0xc   :  { %626 = vsyncadd [#allocation4], 4294967040 }
   0xd   :  { %627 = dma.done.wait [#allocation7], 18432  }
   0xe   :  { %628 = vsyncadd [#allocation7], 4294948864  ;;  %v182_v0 = vld [vmem:[#allocation6 + $0x380] sm:$0xff]  ;;  %v183_v2 = vld [vmem:[#allocation6 + $0x388] sm:$0xff]  ;;  %vm402_vm0 = vcmask 1041408   ;;  %s504_s10 = sshll.u32 %s692_s4, 4  ;;  %s505_s10 = int_to_ptr.hbm [resolvable:$true] %s504_s10 }
   0xf   :  { %v190_v1 = vld [vmem:[#allocation6 + $0x3c0] sm:$0xff]  ;;  %v191_v4 = vld [vmem:[#allocation6 + $0x3c8] sm:$0xff]  ;;  %v184_v5 = vld [vmem:[#allocation6 + $0x390] sm:$0xff] }
  0x10   :  { %v284_v3 = vpack.c.bf16 %v190_v1, %v182_v0  ;;  %v192_v6 = vld [vmem:[#allocation6 + $0x3d0] sm:$0xff]  ;;  %v285_v7 = vpack.c.bf16 %v191_v4, %v183_v2  ;;  %v185_v9 = vld [vmem:[#allocation6 + $0x398] sm:$0xff]  ;;  %v166_v12 = vld [vmem:[#allocation6 + $0x300] sm:$0xff] }
  0x11   :  { %v286_v8 = vpack.c.bf16 %v192_v6, %v184_v5  ;;  %v193_v10 = vld [vmem:[#allocation6 + $0x3d8] sm:$0xff]  ;;  %v174_v13 = vld [vmem:[#allocation6 + $0x340] sm:$0xff]  ;;  %v167_v14 = vld [vmem:[#allocation6 + $0x308] sm:$0xff] }
  0x12   :  { %292 = vmatpush.bf16.xpose.msra.mxu0 %v284_v3  ;;  %v287_v11 = vpack.c.bf16 %v193_v10, %v185_v9  ;;  %305 = vmatpush.bf16.xpose.msra.mxu1 %v285_v7  ;;  %v175_v15 = vld [vmem:[#allocation6 + $0x348] sm:$0xff]  ;;  %v168_v16 = vld [vmem:[#allocation6 + $0x310] sm:$0xff]  ;;  %v169_v18 = vld [vmem:[#allocation6 + $0x318] sm:$0xff]  ;;  %v276_v20 = vpack.c.bf16 %v174_v13, %v166_v12 }
  0x13   :  { %318 = vmatpush.bf16.xpose.msra.mxu2 %v286_v8  ;;  %v176_v17 = vld [vmem:[#allocation6 + $0x350] sm:$0xff]  ;;  %v177_v19 = vld [vmem:[#allocation6 + $0x358] sm:$0xff]  ;;  %v277_v21 = vpack.c.bf16 %v175_v15, %v167_v14  ;;  %v150_v24 = vld [vmem:[#allocation6 + $0x280] sm:$0xff] }
  0x14   :  { %331 = vmatpush.bf16.xpose.msra.mxu3 %v287_v11  ;;  %v278_v22 = vpack.c.bf16 %v176_v17, %v168_v16  ;;  %v279_v23 = vpack.c.bf16 %v177_v19, %v169_v18  ;;  %v158_v25 = vld [vmem:[#allocation6 + $0x2c0] sm:$0xff]  ;;  %v151_v26 = vld [vmem:[#allocation6 + $0x288] sm:$0xff]  ;;  %v152_v28 = vld [vmem:[#allocation6 + $0x290] sm:$0xff] }
  0x15   :  { %v159_v27 = vld [vmem:[#allocation6 + $0x2c8] sm:$0xff]  ;;  %v160_v29 = vld [vmem:[#allocation6 + $0x2d0] sm:$0xff]  ;;  %v153_v30 = vld [vmem:[#allocation6 + $0x298] sm:$0xff]  ;;  %v268_v32 = vpack.c.bf16 %v158_v25, %v150_v24 }
  0x16   :  { %v161_v31 = vld [vmem:[#allocation6 + $0x2d8] sm:$0xff]  ;;  %v269_v33 = vpack.c.bf16 %v159_v27, %v151_v26  ;;  %v270_v34 = vpack.c.bf16 %v160_v29, %v152_v28  ;;  %v134_v36 = vld [vmem:[#allocation6 + $0x200] sm:$0xff]  ;;  %v135_v38 = vld [vmem:[#allocation6 + $0x208] sm:$0xff] }
  0x17   :  { %v271_v35 = vpack.c.bf16 %v161_v31, %v153_v30  ;;  %v142_v37 = vld [vmem:[#allocation6 + $0x240] sm:$0xff]  ;;  %v143_v39 = vld [vmem:[#allocation6 + $0x248] sm:$0xff]  ;;  %v136_v40 = vld [vmem:[#allocation6 + $0x210] sm:$0xff] }
  0x18   :  { %v144_v41 = vld [vmem:[#allocation6 + $0x250] sm:$0xff]  ;;  %v137_v42 = vld [vmem:[#allocation6 + $0x218] sm:$0xff]  ;;  %v260_v44 = vpack.c.bf16 %v142_v37, %v134_v36  ;;  %v261_v45 = vpack.c.bf16 %v143_v39, %v135_v38  ;;  %v118_v48 = vld [vmem:[#allocation6 + $0x180] sm:$0xff] }
  0x19   :  { %v145_v43 = vld [vmem:[#allocation6 + $0x258] sm:$0xff]  ;;  %v262_v46 = vpack.c.bf16 %v144_v41, %v136_v40  ;;  %v126_v49 = vld [vmem:[#allocation6 + $0x1c0] sm:$0xff]  ;;  %v119_v50 = vld [vmem:[#allocation6 + $0x188] sm:$0xff] }
  0x1a   :  { %293 = vmatpush.bf16.xpose.msra.mxu0 %v276_v20  ;;  %306 = vmatpush.bf16.xpose.msra.mxu1 %v277_v21  ;;  %v263_v47 = vpack.c.bf16 %v145_v43, %v137_v42  ;;  %v127_v51 = vld [vmem:[#allocation6 + $0x1c8] sm:$0xff]  ;;  %v120_v52 = vld [vmem:[#allocation6 + $0x190] sm:$0xff]  ;;  %v121_v54 = vld [vmem:[#allocation6 + $0x198] sm:$0xff]  ;;  %v252_v56 = vpack.c.bf16 %v126_v49, %v118_v48 }
  0x1b   :  { %319 = vmatpush.bf16.xpose.msra.mxu2 %v278_v22  ;;  %v128_v53 = vld [vmem:[#allocation6 + $0x1d0] sm:$0xff]  ;;  %v129_v55 = vld [vmem:[#allocation6 + $0x1d8] sm:$0xff]  ;;  %v253_v57 = vpack.c.bf16 %v127_v51, %v119_v50  ;;  %v102_v60 = vld [vmem:[#allocation6 + $0x100] sm:$0xff] }
  0x1c   :  { %332 = vmatpush.bf16.xpose.msra.mxu3 %v279_v23  ;;  %v254_v58 = vpack.c.bf16 %v128_v53, %v120_v52  ;;  %v255_v59 = vpack.c.bf16 %v129_v55, %v121_v54  ;;  %v110_v61 = vld [vmem:[#allocation6 + $0x140] sm:$0xff]  ;;  %v103_v62 = vld [vmem:[#allocation6 + $0x108] sm:$0xff]  ;;  %v104_v0 = vld [vmem:[#allocation6 + $0x110] sm:$0xff] }
  0x1d   :  { %v111_v63 = vld [vmem:[#allocation6 + $0x148] sm:$0xff]  ;;  %v112_v1 = vld [vmem:[#allocation6 + $0x150] sm:$0xff]  ;;  %v105_v2 = vld [vmem:[#allocation6 + $0x118] sm:$0xff]  ;;  %v244_v4 = vpack.c.bf16 %v110_v61, %v102_v60 }
  0x1e   :  { %v113_v3 = vld [vmem:[#allocation6 + $0x158] sm:$0xff]  ;;  %v245_v5 = vpack.c.bf16 %v111_v63, %v103_v62  ;;  %v246_v6 = vpack.c.bf16 %v112_v1, %v104_v0  ;;  %v86_v8 = vld [vmem:[#allocation6 + $0x80] sm:$0xff]  ;;  %v87_v10 = vld [vmem:[#allocation6 + $0x88] sm:$0xff] }
  0x1f   :  { %v247_v7 = vpack.c.bf16 %v113_v3, %v105_v2  ;;  %v94_v9 = vld [vmem:[#allocation6 + $0xc0] sm:$0xff]  ;;  %v95_v11 = vld [vmem:[#allocation6 + $0xc8] sm:$0xff]  ;;  %v88_v12 = vld [vmem:[#allocation6 + $0x90] sm:$0xff] }
  0x20   :  { %v96_v13 = vld [vmem:[#allocation6 + $0xd0] sm:$0xff]  ;;  %v89_v14 = vld [vmem:[#allocation6 + $0x98] sm:$0xff]  ;;  %v236_v16 = vpack.c.bf16 %v94_v9, %v86_v8  ;;  %v237_v17 = vpack.c.bf16 %v95_v11, %v87_v10  ;;  %v70_v20 = vld [vmem:[#allocation6] sm:$0xff] }
  0x21   :  { %v97_v15 = vld [vmem:[#allocation6 + $0xd8] sm:$0xff]  ;;  %v238_v18 = vpack.c.bf16 %v96_v13, %v88_v12  ;;  %v78_v21 = vld [vmem:[#allocation6 + $0x40] sm:$0xff]  ;;  %v71_v22 = vld [vmem:[#allocation6 + $0x8] sm:$0xff] }
  0x22   :  { %294 = vmatpush.bf16.xpose.msra.mxu0 %v268_v32  ;;  %307 = vmatpush.bf16.xpose.msra.mxu1 %v269_v33  ;;  %v239_v19 = vpack.c.bf16 %v97_v15, %v89_v14  ;;  %v79_v23 = vld [vmem:[#allocation6 + $0x48] sm:$0xff]  ;;  %v72_v24 = vld [vmem:[#allocation6 + $0x10] sm:$0xff]  ;;  %v73_v26 = vld [vmem:[#allocation6 + $0x18] sm:$0xff]  ;;  %v228_v31 = vpack.c.bf16 %v78_v21, %v70_v20 }
  0x23   :  { %320 = vmatpush.bf16.xpose.msra.mxu2 %v270_v34  ;;  %v80_v25 = vld [vmem:[#allocation6 + $0x50] sm:$0xff]  ;;  %v81_v27 = vld [vmem:[#allocation6 + $0x58] sm:$0xff]  ;;  %v186_v28 = vld [vmem:[#allocation6 + $0x3a0] sm:$0xff] }
  0x24   :  { %333 = vmatpush.bf16.xpose.msra.mxu3 %v271_v35  ;;  %v194_v29 = vld [vmem:[#allocation6 + $0x3e0] sm:$0xff]  ;;  %v187_v30 = vld [vmem:[#allocation6 + $0x3a8] sm:$0xff]  ;;  %v188_v33 = vld [vmem:[#allocation6 + $0x3b0] sm:$0xff]  ;;  %v229_v35 = vpack.c.bf16 %v79_v23, %v71_v22  ;;  %v230_v36 = vpack.c.bf16 %v80_v25, %v72_v24  ;;  %v231_v39 = vpack.c.bf16 %v81_v27, %v73_v26 }
  0x25   :  { %v195_v32 = vld [vmem:[#allocation6 + $0x3e8] sm:$0xff]  ;;  %v196_v34 = vld [vmem:[#allocation6 + $0x3f0] sm:$0xff]  ;;  %v189_v37 = vld [vmem:[#allocation6 + $0x3b8] sm:$0xff]  ;;  %v288_v40 = vpack.c.bf16 %v194_v29, %v186_v28 }
  0x26   :  { %v197_v38 = vld [vmem:[#allocation6 + $0x3f8] sm:$0xff]  ;;  %v289_v41 = vpack.c.bf16 %v195_v32, %v187_v30  ;;  %v290_v42 = vpack.c.bf16 %v196_v34, %v188_v33  ;;  %v179_v48 = vld [vmem:[#allocation6 + $0x368] sm:$0xff]  ;;  %v172_v49 = vld [vmem:[#allocation6 + $0x330] sm:$0xff] }
  0x27   :  { %v291_v43 = vpack.c.bf16 %v197_v38, %v189_v37  ;;  %v180_v50 = vld [vmem:[#allocation6 + $0x370] sm:$0xff]  ;;  %v173_v51 = vld [vmem:[#allocation6 + $0x338] sm:$0xff]  ;;  %v162_v60 = vld [vmem:[#allocation6 + $0x2e0] sm:$0xff] }
  0x28   :  { %v181_v52 = vld [vmem:[#allocation6 + $0x378] sm:$0xff]  ;;  %v282_v55 = vpack.c.bf16 %v180_v50, %v172_v49  ;;  %v155_v61 = vld [vmem:[#allocation6 + $0x2a8] sm:$0xff]  ;;  %v156_v1 = vld [vmem:[#allocation6 + $0x2b0] sm:$0xff] }
  0x29   :  { %v163_v62 = vld [vmem:[#allocation6 + $0x2e8] sm:$0xff]  ;;  %v164_v2 = vld [vmem:[#allocation6 + $0x2f0] sm:$0xff]  ;;  %v138_v13 = vld [vmem:[#allocation6 + $0x220] sm:$0xff] }
  0x2a   :  { %295 = vmatpush.bf16.xpose.msra.mxu0 %v260_v44  ;;  %308 = vmatpush.bf16.xpose.msra.mxu1 %v261_v45  ;;  %v68_v44 = vld [vmem:[#allocation3] sm:$0xff]  ;;  %v170_v45 = vld [vmem:[#allocation6 + $0x320] sm:$0xff]  ;;  %v273_v10 = vpack.c.bf16 %v163_v62, %v155_v61  ;;  %v274_v11 = vpack.c.bf16 %v164_v2, %v156_v1  ;;  %v139_v15 = vld [vmem:[#allocation6 + $0x228] sm:$0xff] }
  0x2b   :  { %321 = vmatpush.bf16.xpose.msra.mxu2 %v262_v46  ;;  %201 = vst [vmem:[#allocation1] ss:$4 sm:$0xff] %v68_v44  ;;  %v178_v46 = vld [vmem:[#allocation6 + $0x360] sm:$0xff]  ;;  %v149_v20 = vld [vmem:[#allocation6 + $0x278] sm:$0xff]  ;;  %v123_v28 = vld [vmem:[#allocation6 + $0x1a8] sm:$0xff] }
  0x2c   :  { %334 = vmatpush.bf16.xpose.msra.mxu3 %v263_v47  ;;  %v171_v47 = vld [vmem:[#allocation6 + $0x328] sm:$0xff]  ;;  %v280_v53 = vpack.c.bf16 %v178_v46, %v170_v45  ;;  %v146_v14 = vld [vmem:[#allocation6 + $0x260] sm:$0xff]  ;;  %v69_v25 = vld [vmem:[#allocation3 + $0x8] sm:$0xff] }
  0x2d   :  { %v281_v54 = vpack.c.bf16 %v179_v48, %v171_v47  ;;  %v264_v21 = vpack.c.bf16 %v146_v14, %v138_v13  ;;  %203 = vst [vmem:[#allocation1 + $0x20] ss:$4 sm:$0xff] %v69_v25  ;;  %v122_v26 = vld [vmem:[#allocation6 + $0x1a0] sm:$0xff]  ;;  %v131_v29 = vld [vmem:[#allocation6 + $0x1e8] sm:$0xff]  ;;  %v124_v30 = vld [vmem:[#allocation6 + $0x1b0] sm:$0xff] }
  0x2e   :  { %v130_v27 = vld [vmem:[#allocation6 + $0x1e0] sm:$0xff]  ;;  %v125_v32 = vld [vmem:[#allocation6 + $0x1b8] sm:$0xff]  ;;  %v83_v1 = vld [vmem:[#allocation6 + $0x68] sm:$0xff] }
  0x2f   :  { %v133_v33 = vld [vmem:[#allocation6 + $0x1f8] sm:$0xff]  ;;  %v256_v34 = vpack.c.bf16 %v130_v27, %v122_v26  ;;  %v106_v38 = vld [vmem:[#allocation6 + $0x120] sm:$0xff]  ;;  %v76_v2 = vld [vmem:[#allocation6 + $0x30] sm:$0xff]  ;;  %v638_v26 = vmov 0.0  }
  0x30   :  { %v259_v37 = vpack.c.bf16 %v133_v33, %v125_v32  ;;  %v109_v44 = vld [vmem:[#allocation6 + $0x138] sm:$0xff]  ;;  %v90_v50 = vld [vmem:[#allocation6 + $0xa0] sm:$0xff]  ;;  %67 = vst [vmem:[#allocation2] sm:$0x3] %v638_v26 }
  0x31   :  { %v117_v45 = vld [vmem:[#allocation6 + $0x178] sm:$0xff]  ;;  %v74_v62 = vld [vmem:[#allocation6 + $0x20] sm:$0xff] }
  0x32   :  { %296 = vmatpush.bf16.xpose.msra.mxu0 %v252_v56  ;;  %309 = vmatpush.bf16.xpose.msra.mxu1 %v253_v57  ;;  %v283_v56 = vpack.c.bf16 %v181_v52, %v173_v51  ;;  %v206_v57 = vld.sshfl [vmem:[#allocation1 + $0x10] sm:$0xff pattern:$0x73625140]  ;;  %v204_v63 = vld.sshfl [vmem:[#allocation1] sm:$0xff pattern:$0x73625140]  ;;  %v251_v49 = vpack.c.bf16 %v117_v45, %v109_v44 }
  0x33   :  { %322 = vmatpush.bf16.xpose.msra.mxu2 %v254_v58  ;;  %v154_v58 = vld [vmem:[#allocation6 + $0x2a0] sm:$0xff]  ;;  %v220_v3 = vpack.c.bf16 %v204_v63, %v204_v63  ;;  %v91_v52 = vld [vmem:[#allocation6 + $0xa8] sm:$0xff] }
  0x34   :  { %335 = vmatpush.bf16.xpose.msra.mxu3 %v255_v59  ;;  %v222_v59 = vpack.c.bf16 %v206_v57, %v206_v57  ;;  %v207_v0 = vld.sshfl [vmem:[#allocation1 + $0x18] sm:$0xff pattern:$0x73625140]  ;;  %v272_v9 = vpack.c.bf16 %v162_v60, %v154_v58 }
  0x35   :  { %v98_v51 = vld [vmem:[#allocation6 + $0xe0] sm:$0xff]  ;;  %v101_v57 = vld [vmem:[#allocation6 + $0xf8] sm:$0xff] }
  0x36   :  { %v240_v58 = vpack.c.bf16 %v98_v51, %v90_v50  ;;  %v82_v63 = vld [vmem:[#allocation6 + $0x60] sm:$0xff] }
  0x37   :  { %v211_v13 = vld.sshfl [vmem:[#allocation1 + $0x38] sm:$0xff pattern:$0x73625140] }
  0x3a   :  { %297 = vmatpush.bf16.xpose.msra.mxu0 %v244_v4  ;;  %310 = vmatpush.bf16.xpose.msra.mxu1 %v245_v5  ;;  %v223_v4 = vpack.c.bf16 %v207_v0, %v207_v0  ;;  %v205_v5 = vld.sshfl [vmem:[#allocation1 + $0x8] sm:$0xff pattern:$0x73625140] }
  0x3b   :  { %323 = vmatpush.bf16.xpose.msra.mxu2 %v246_v6  ;;  %v157_v6 = vld [vmem:[#allocation6 + $0x2b8] sm:$0xff]  ;;  %v221_v8 = vpack.c.bf16 %v205_v5, %v205_v5  ;;  %v75_v0 = vld [vmem:[#allocation6 + $0x28] sm:$0xff] }
  0x3c   :  { %336 = vmatpush.bf16.xpose.msra.mxu3 %v247_v7  ;;  %v165_v7 = vld [vmem:[#allocation6 + $0x2f8] sm:$0xff] }
  0x3d   :  { %v275_v12 = vpack.c.bf16 %v165_v7, %v157_v6  ;;  %v85_v5 = vld [vmem:[#allocation6 + $0x78] sm:$0xff]  ;;  %v232_v6 = vpack.c.bf16 %v82_v63, %v74_v62  ;;  %v233_v7 = vpack.c.bf16 %v83_v1, %v75_v0 }
  0x42   :  { %298 = vmatpush.bf16.xpose.msra.mxu0 %v236_v16  ;;  %311 = vmatpush.bf16.xpose.msra.mxu1 %v237_v17  ;;  %v147_v16 = vld [vmem:[#allocation6 + $0x268] sm:$0xff]  ;;  %v140_v17 = vld [vmem:[#allocation6 + $0x230] sm:$0xff] }
  0x43   :  { %324 = vmatpush.bf16.xpose.msra.mxu2 %v238_v18  ;;  %v148_v18 = vld [vmem:[#allocation6 + $0x270] sm:$0xff]  ;;  %v265_v22 = vpack.c.bf16 %v147_v16, %v139_v15 }
  0x44   :  { %337 = vmatpush.bf16.xpose.msra.mxu3 %v239_v19  ;;  %v141_v19 = vld [vmem:[#allocation6 + $0x238] sm:$0xff]  ;;  %v266_v23 = vpack.c.bf16 %v148_v18, %v140_v17  ;;  %v227_v17 = vpack.c.bf16 %v211_v13, %v211_v13 }
  0x45   :  { %v267_v24 = vpack.c.bf16 %v149_v20, %v141_v19 }
  0x4a   :  { %299 = vmatpush.bf16.xpose.msra.mxu0 %v228_v31  ;;  %312 = vmatpush.bf16.xpose.msra.mxu1 %v229_v35  ;;  %v132_v31 = vld [vmem:[#allocation6 + $0x1f0] sm:$0xff]  ;;  %v257_v35 = vpack.c.bf16 %v131_v29, %v123_v28 }
  0x4b   :  { %325 = vmatpush.bf16.xpose.msra.mxu2 %v230_v36  ;;  %v258_v36 = vpack.c.bf16 %v132_v31, %v124_v30 }
  0x4c   :  { %338 = vmatpush.bf16.xpose.msra.mxu3 %v231_v39  ;;  %v114_v39 = vld [vmem:[#allocation6 + $0x160] sm:$0xff] }
  0x4d   :  { %v248_v46 = vpack.c.bf16 %v114_v39, %v106_v38  ;;  %v198_v39 = vld [vmem:[#allocation2] sm:$0x3] }
  0x51   :  { %300 = vmatmul.bf16.vlgmr.msra.gmra.mxu0 %v220_v3  ;;  %313 = vmatmul.bf16.vlgmr.msra.gmra.mxu1 %v221_v8  ;;  %v84_v3 = vld [vmem:[#allocation6 + $0x70] sm:$0xff] }
  0x52   :  { %344 = vmatpush.bf16.xpose.msrb.mxu0 %v288_v40  ;;  %357 = vmatpush.bf16.xpose.msrb.mxu1 %v289_v41  ;;  %v107_v40 = vld [vmem:[#allocation6 + $0x128] sm:$0xff]  ;;  %v234_v8 = vpack.c.bf16 %v84_v3, %v76_v2 }
  0x53   :  { %370 = vmatpush.bf16.xpose.msrb.mxu2 %v290_v42  ;;  %339 = vmatmul.bf16.vlgmr.msra.gmra.mxu3 %v223_v4  ;;  %v115_v41 = vld [vmem:[#allocation6 + $0x168] sm:$0xff]  ;;  %v108_v42 = vld [vmem:[#allocation6 + $0x130] sm:$0xff]  ;;  %v77_v4 = vld [vmem:[#allocation6 + $0x38] sm:$0xff] }
  0x54   :  { %383 = vmatpush.bf16.xpose.msrb.mxu3 %v291_v43  ;;  %326 = vmatmul.bf16.vlgmr.msra.gmra.mxu2 %v222_v59  ;;  %v116_v43 = vld [vmem:[#allocation6 + $0x170] sm:$0xff]  ;;  %v249_v47 = vpack.c.bf16 %v115_v41, %v107_v40 }
  0x55   :  { %v250_v48 = vpack.c.bf16 %v116_v43, %v108_v42 }
  0x5a   :  { %345 = vmatpush.bf16.xpose.msrb.mxu0 %v280_v53  ;;  %358 = vmatpush.bf16.xpose.msrb.mxu1 %v281_v54  ;;  %v99_v53 = vld [vmem:[#allocation6 + $0xe8] sm:$0xff]  ;;  %v92_v54 = vld [vmem:[#allocation6 + $0xb0] sm:$0xff] }
  0x5b   :  { %371 = vmatpush.bf16.xpose.msrb.mxu2 %v282_v55  ;;  %v100_v55 = vld [vmem:[#allocation6 + $0xf0] sm:$0xff]  ;;  %v241_v59 = vpack.c.bf16 %v99_v53, %v91_v52 }
  0x5c   :  { %384 = vmatpush.bf16.xpose.msrb.mxu3 %v283_v56  ;;  %v93_v56 = vld [vmem:[#allocation6 + $0xb8] sm:$0xff]  ;;  %v242_v60 = vpack.c.bf16 %v100_v55, %v92_v54 }
  0x5d   :  { %v243_v61 = vpack.c.bf16 %v101_v57, %v93_v56 }
  0x62   :  { %346 = vmatpush.bf16.xpose.msrb.mxu0 %v272_v9  ;;  %359 = vmatpush.bf16.xpose.msrb.mxu1 %v273_v10  ;;  %v235_v9 = vpack.c.bf16 %v85_v5, %v77_v4  ;;  %v208_v10 = vld.sshfl [vmem:[#allocation1 + $0x20] sm:$0xff pattern:$0x73625140] }
  0x63   :  { %372 = vmatpush.bf16.xpose.msrb.mxu2 %v274_v11  ;;  %v209_v11 = vld.sshfl [vmem:[#allocation1 + $0x28] sm:$0xff pattern:$0x73625140]  ;;  %v224_v14 = vpack.c.bf16 %v208_v10, %v208_v10 }
  0x64   :  { %385 = vmatpush.bf16.xpose.msrb.mxu3 %v275_v12  ;;  %v210_v12 = vld.sshfl [vmem:[#allocation1 + $0x30] sm:$0xff pattern:$0x73625140]  ;;  %v225_v15 = vpack.c.bf16 %v209_v11, %v209_v11 }
  0x65   :  { %v226_v16 = vpack.c.bf16 %v210_v12, %v210_v12  ;;  %v428_v12 = vld [vmem:[%s690_s2] sm:$0x1]  ;;  %s640_s2 = smov [#allocation9]  }
  0x66   :  { %s502_s7 = sshll.u32 %s640_s2, 4  ;;  %s503_s7 = int_to_ptr.vmem [resolvable:$true] %s502_s7 }
  0x6a   :  { %347 = vmatpush.bf16.xpose.msrb.mxu0 %v264_v21  ;;  %360 = vmatpush.bf16.xpose.msrb.mxu1 %v265_v22 }
  0x6b   :  { %373 = vmatpush.bf16.xpose.msrb.mxu2 %v266_v23 }
  0x6c   :  { %386 = vmatpush.bf16.xpose.msrb.mxu3 %v267_v24 }
  0x72   :  { %348 = vmatpush.bf16.xpose.msrb.mxu0 %v256_v34  ;;  %361 = vmatpush.bf16.xpose.msrb.mxu1 %v257_v35  ;;  %v639_v35 = vmov 2.0  }
  0x73   :  { %374 = vmatpush.bf16.xpose.msrb.mxu2 %v258_v36  ;;  %525 = vrcp.f32 %v639_v35  ;;  %v447_v35 = vld [vmem:[#allocation8 + $0x30] sm:$0xff] }
  0x74   :  { %387 = vmatpush.bf16.xpose.msrb.mxu3 %v259_v37 }
  0x79   :  { %v526_v43 = vpop.eup %525 }
  0x7a   :  { %349 = vmatpush.bf16.xpose.msrb.mxu0 %v248_v46  ;;  %362 = vmatpush.bf16.xpose.msrb.mxu1 %v249_v47  ;;  %v411_v45 = vmul.f32 2.0, %v526_v43  ;;  %vm415_vm1 = vweird.f32 %v526_v43 }
  0x7b   :  { %375 = vmatpush.bf16.xpose.msrb.mxu2 %v250_v48 }
  0x7c   :  { %388 = vmatpush.bf16.xpose.msrb.mxu3 %v251_v49  ;;  %v412_v47 = vsub.f32 1.0, %v411_v45  ;;  %v442_v45 = vld [vmem:[#allocation8 + $0x8] sm:$0xff] }
  0x7e   :  { %v413_v51 = vmul.f32 %v526_v43, %v412_v47  ;;  %v441_v47 = vld [vmem:[#allocation8] sm:$0xff] }
  0x80   :  { %v414_v54 = vadd.f32 %v526_v43, %v413_v51 }
  0x82   :  { %350 = vmatpush.bf16.xpose.msrb.mxu0 %v240_v58  ;;  %363 = vmatpush.bf16.xpose.msrb.mxu1 %v241_v59  ;;  %v416_v57 = vsel %vm415_vm1, %v526_v43, %v414_v54  ;;  %v443_v43 = vld [vmem:[#allocation8 + $0x10] sm:$0xff] }
  0x83   :  { %376 = vmatpush.bf16.xpose.msrb.mxu2 %v242_v60 }
  0x84   :  { %389 = vmatpush.bf16.xpose.msrb.mxu3 %v243_v61 }
  0x8a   :  { %351 = vmatpush.bf16.xpose.msrb.mxu0 %v232_v6  ;;  %364 = vmatpush.bf16.xpose.msrb.mxu1 %v233_v7 }
  0x8b   :  { %377 = vmatpush.bf16.xpose.msrb.mxu2 %v234_v8 }
  0x8c   :  { %390 = vmatpush.bf16.xpose.msrb.mxu3 %v235_v9 }
  0x91   :  { %352 = vmatmul.bf16.vlgmr.msrb.gmra.mxu0 %v224_v14  ;;  %365 = vmatmul.bf16.vlgmr.msrb.gmra.mxu1 %v225_v15 }
  0x92   :  { %378 = vmatmul.bf16.vlgmr.msrb.gmra.mxu2 %v226_v16  ;;  %v456_v16 = vld [vmem:[#allocation8 + $0x78] sm:$0xff] }
  0x93   :  { %391 = vmatmul.bf16.vlgmr.msrb.gmra.mxu3 %v227_v17 }
  0xce   :  { %v301_v18 = vpop.f32.mrf.mxu0  ;;  %v314_v19 = vpop.f32.mrf.mxu1 }
  0xcf   :  { %v315_v27 = vadd.f32 %v314_v19, %v301_v18  ;;  %v455_v19 = vld [vmem:[#allocation8 + $0x70] sm:$0xff] }
  0xd6   :  { %v340_v21 = vpop.f32.mrf.mxu3  ;;  %v303_v22 = vpop.f32.mrf.mxu0 }
  0xd7   :  { %v327_v20 = vpop.f32.mrf.mxu2  ;;  %v316_v23 = vpop.f32.mrf.mxu1 }
  0xd8   :  { %v328_v28 = vadd.f32 %v327_v20, %v315_v27  ;;  %v453_v23 = vld [vmem:[#allocation8 + $0x60] sm:$0xff]  ;;  %v451_v27 = vld [vmem:[#allocation8 + $0x50] sm:$0xff] }
  0xda   :  { %v341_v29 = vadd.f32 %v340_v21, %v328_v28  ;;  %v454_v21 = vld [vmem:[#allocation8 + $0x68] sm:$0xff] }
  0xde   :  { %v342_v25 = vpop.f32.mrf.mxu3 }
  0xdf   :  { %v329_v24 = vpop.f32.mrf.mxu2  ;;  %v452_v25 = vld [vmem:[#allocation8 + $0x58] sm:$0xff] }
 0x10e   :  { %v353_v30 = vpop.f32.mrf.mxu0  ;;  %v366_v31 = vpop.f32.mrf.mxu1 }
 0x10f   :  { %v354_v32 = vadd.f32 %v353_v30, %v341_v29  ;;  %v450_v29 = vld [vmem:[#allocation8 + $0x48] sm:$0xff] }
 0x111   :  { %v367_v33 = vadd.f32 %v366_v31, %v354_v32  ;;  %v449_v31 = vld [vmem:[#allocation8 + $0x40] sm:$0xff] }
 0x115   :  { %v379_v34 = vpop.f32.mrf.mxu2 }
 0x116   :  { %v380_v36 = vadd.f32 %v379_v34, %v367_v33  ;;  %v392_v37 = vpop.f32.mrf.mxu3  ;;  %v355_v38 = vpop.f32.mrf.mxu0  ;;  %v448_v33 = vld [vmem:[#allocation8 + $0x38] sm:$0xff] }
 0x117   :  { %v368_v40 = vpop.f32.mrf.mxu1 }
 0x118   :  { %v393_v41 = vadd.f32 %v392_v37, %v380_v36  ;;  %v446_v37 = vld [vmem:[#allocation8 + $0x28] sm:$0xff] }
 0x11a   :  { %v396_v42 = vadd.f32 %v393_v41, %v198_v39  ;;  %v445_v39 = vld [vmem:[#allocation8 + $0x20] sm:$0xff]  ;;  %v444_v41 = vld [vmem:[#allocation8 + $0x18] sm:$0xff] }
 0x11c   :  { %397 = vst [vmem:[#allocation2] sm:$0x3] %v396_v42 }
 0x11d   :  { %v381_v44 = vpop.f32.mrf.mxu2 }
 0x11e   :  { %v394_v46 = vpop.f32.mrf.mxu3 }
 0x123   :  { %v401_v48 = vld [vmem:[#allocation2] sm:$0x3] }
 0x124   :  { %v403_v49 = vsel %vm402_vm0, %v401_v48, 0.0 }
 0x125   :  { %v404_v50 = vrot.slane %v403_v49, 4 }
 0x127   :  { %v405_v52 = vadd.f32 %v404_v50, %v403_v49 }
 0x129   :  { %v406_v53 = vrot.slane %v405_v52, 2 }
 0x12b   :  { %v407_v55 = vadd.f32 %v406_v53, %v405_v52 }
 0x12d   :  { %v408_v56 = vrot.slane %v407_v55, 1 }
 0x12f   :  { %v409_v58 = vadd.f32 %v408_v56, %v407_v55 }
 0x131   :  { %v417_v59 = vmul.f32 %v416_v57, %v409_v58 }
 0x133   :  { %v676_v60 = vsub.f32 %v401_v48, %v417_v59 }
 0x135   :  { %v419_v61 = vmul.f32 %v676_v60, %v676_v60 }
 0x137   :  { %v420_v62 = vsel %vm402_vm0, %v419_v61, 0.0 }
 0x138   :  { %v421_v63 = vrot.slane %v420_v62, 4 }
 0x13a   :  { %v422_v0 = vadd.f32 %v421_v63, %v420_v62 }
 0x13c   :  { %v423_v1 = vrot.slane %v422_v0, 2 }
 0x13e   :  { %v424_v2 = vadd.f32 %v423_v1, %v422_v0 }
 0x140   :  { %v425_v3 = vrot.slane %v424_v2, 1 }
 0x142   :  { %v426_v4 = vadd.f32 %v425_v3, %v424_v2 }
 0x144   :  { %v427_v5 = vmul.f32 %v426_v4, %v416_v57 }
 0x146   :  { %v429_v6 = vadd.f32 1e-05, %v427_v5 }
 0x148   :  { %527 = vrsqrt.f32 %v429_v6  ;;  %vm436_vm3 = vweird.f32 %v429_v6 }
 0x14e   :  { %v528_v7 = vpop.eup %527 }
 0x14f   :  { %v431_v8 = vmul.f32 %v528_v7, %v429_v6  ;;  %vm437_vm2 = vweird.f32 %v528_v7 }
 0x150   :  { %vm438_vm4 = vmor %vm436_vm3, %vm437_vm2 }
 0x151   :  { %v432_v9 = vmul.f32 %v528_v7, %v431_v8 }
 0x153   :  { %v433_v10 = vmul.f32 0.5, %v432_v9 }
 0x155   :  { %v434_v11 = vsub.f32 1.5, %v433_v10 }
 0x157   :  { %v435_v13 = vmul.f32 %v528_v7, %v434_v11 }
 0x159   :  { %v439_v14 = vsel %vm438_vm4, %v528_v7, %v435_v13 }
 0x15a   :  { %v440_v15 = vmul.f32 %v439_v14, %v428_v12 }
 0x15c   :  { %v458_v17 = vperm.slane %v440_v15, 0 }
 0x15e   :  { %v475_v18 = vmul.f32 %v458_v17, %v456_v16  ;;  %v474_v20 = vmul.f32 %v458_v17, %v455_v19  ;;  %v473_v22 = vmul.f32 %v458_v17, %v454_v21  ;;  %v472_v24 = vmul.f32 %v458_v17, %v453_v23 }
 0x15f   :  { %v471_v26 = vmul.f32 %v458_v17, %v452_v25  ;;  %v470_v28 = vmul.f32 %v458_v17, %v451_v27  ;;  %v469_v30 = vmul.f32 %v458_v17, %v450_v29  ;;  %v468_v32 = vmul.f32 %v458_v17, %v449_v31 }
 0x160   :  { %476 = vmatpush.xpose.msra.mxu0 %v475_v18  ;;  %v467_v34 = vmul.f32 %v458_v17, %v448_v33  ;;  %v466_v36 = vmul.f32 %v458_v17, %v447_v35  ;;  %v465_v38 = vmul.f32 %v458_v17, %v446_v37  ;;  %v464_v40 = vmul.f32 %v458_v17, %v445_v39 }
 0x161   :  { %v463_v42 = vmul.f32 %v458_v17, %v444_v41  ;;  %v462_v44 = vmul.f32 %v458_v17, %v443_v43  ;;  %v461_v46 = vmul.f32 %v458_v17, %v442_v45  ;;  %v460_v48 = vmul.f32 %v458_v17, %v441_v47 }
 0x164   :  { %477 = vmatpush.xpose.msra.mxu0 %v474_v20 }
 0x168   :  { %478 = vmatpush.xpose.msra.mxu0 %v473_v22 }
 0x16c   :  { %479 = vmatpush.xpose.msra.mxu0 %v472_v24 }
 0x170   :  { %480 = vmatpush.xpose.msra.mxu0 %v471_v26 }
 0x174   :  { %481 = vmatpush.xpose.msra.mxu0 %v470_v28 }
 0x178   :  { %482 = vmatpush.xpose.msra.mxu0 %v469_v30 }
 0x17c   :  { %483 = vmatpush.xpose.msra.mxu0 %v468_v32 }
 0x180   :  { %484 = vmatpush.xpose.msra.mxu0 %v467_v34 }
 0x184   :  { %485 = vmatpush.xpose.msra.mxu0 %v466_v36 }
 0x188   :  { %486 = vmatpush.xpose.msra.mxu0 %v465_v38 }
 0x18c   :  { %487 = vmatpush.xpose.msra.mxu0 %v464_v40 }
 0x190   :  { %488 = vmatpush.xpose.msra.mxu0 %v463_v42 }
 0x194   :  { %489 = vmatpush.xpose.msra.mxu0 %v462_v44 }
 0x198   :  { %490 = vmatpush.xpose.msra.mxu0 %v461_v46 }
 0x19c   :  { %491 = vmatpush.xpose.msra.mxu0 %v460_v48 }
 0x19f   :  { %492 = vmatmul.f32.vlgmr.msra.gmra.mxu0 %v676_v60 }
 0x21c   :  { %v493_v49 = vpop.f32.mrf.mxu0 }
 0x21d   :  { %496 = vst [vmem:[#allocation9] sm:$0x3] %v493_v49 }
 0x21e   :  { %507 = dma.vmem_to_hbm [thread:$0]  %s503_s7, 32, %s505_s10, [#allocation5]  }
 0x21f   :  { %629 = dma.done.wait [#allocation5], 32  }
 0x220   :  { %630 = vsyncadd [#allocation5], 4294967264 }
 0x221   :  { %512 = vsyncpa [#allocation4], 1 }
 0x222   :  { %513 = vsyncpa [#allocation7], 1 }
 0x223   :  { %514 = vsyncpa [#allocation5], 1 }

</bundles_post_ra>
